<compile_context>
chip_gen: v7x
topology: tpu7x:2x2x1
jax: 0.10.0
libtpu: 0.0.40
codegen_flags: <defaults>
</compile_context>

<pallas_src>
import functools

import jax
import jax.numpy as jnp
from jax import lax
from jax.experimental import pallas as pl
from jax.experimental.pallas import tpu as pltpu


def _round_up(x, m):
    return ((x + m - 1) // m) * m


def _vmem_budget_bytes():
    """~80% of per-core VMEM (v7x ~51 MiB, v5e/v6e ~102 MiB), capped at 112 MiB."""
    cap = 64 * 1024 * 1024  # conservative fallback (v7x per-TensorCore)
    try:
        cap = int(getattr(pltpu.get_tpu_info(), "vmem_capacity_bytes", cap))
    except Exception:
        pass
    return max(16 * 1024 * 1024, min(int(cap * 0.8), 112 * 1024 * 1024))


def _gcn_kernel(a_ref, x_ref, wt_ref, o_ref, acc_ref, *, n, tk, mask_k):
    """One (row-tile, K-tile) grid step of out = normalize(tanh(A @ (X @ W^T)))."""
    k = pl.program_id(1)

    @pl.when(k == 0)
    def _init():
        acc_ref[...] = jnp.zeros_like(acc_ref)

    a = a_ref[...]          # (tm, tk)  compute dtype
    x = x_ref[...]          # (tk, din) compute dtype
    if mask_k:
        # Ragged last K tile: OOB columns of A / rows of X contain undefined
        # VMEM bytes; zero them so they cannot pollute valid output rows.
        col = k * tk + lax.broadcasted_iota(jnp.int32, a.shape, 1)
        a = jnp.where(col < n, a, jnp.zeros_like(a))
        row = k * tk + lax.broadcasted_iota(jnp.int32, x.shape, 0)
        x = jnp.where(row < n, x, jnp.zeros_like(x))

    # h slab for this K tile (f32 accumulation on the MXU), cast back to the
    # matmul input dtype so the A @ h product uses the native bf16 MXU path.
    h = jnp.dot(x, wt_ref[...], preferred_element_type=jnp.float32)
    acc_ref[...] += jnp.dot(a, h.astype(a.dtype),
                            preferred_element_type=jnp.float32)

    @pl.when(k == pl.num_programs(1) - 1)
    def _finalize():
        y = jnp.tanh(acc_ref[...])
        # F.normalize(dim=1, eps=1e-12): y / max(||y||, eps)
        #   == y * rsqrt(max(sum(y*y), eps^2))   -> rsqrt lands on the EUP slot.
        ss = jnp.sum(y * y, axis=1, keepdims=True)
        o_ref[...] = (y * lax.rsqrt(jnp.maximum(ss, 1e-24))).astype(o_ref.dtype)


def gcn_forward(x, a_hat, weight, *, compute_dtype=jnp.bfloat16,
                block_rows=None, block_k=None):
    """GCN forward: F.normalize(tanh(A_hat @ (x @ weight.T)), dim=1).

    x       : [N, Din]    node features
    a_hat   : [N, N]      normalized adjacency
    weight  : [Dout, Din] nn.Linear weight (PyTorch layout, no bias)
    compute_dtype : dtype of the matmul inputs. bf16 (default) halves A's HBM
                    bytes; accumulation / tanh / normalize stay f32.
                    Use jnp.float32 for exact f32-PyTorch numerics.
    block_rows / block_k : optional tile-size overrides (A rows / contraction).
    """
    n, din = x.shape
    dout, din_w = weight.shape
    assert din == din_w, "weight must be [Dout, Din]"
    assert a_hat.shape == (n, n)

    isize = jnp.dtype(compute_dtype).itemsize
    budget = _vmem_budget_bytes()

    # ---- tile sizing -------------------------------------------------------
    small_n = n <= 1024
    if block_rows is None:
        if small_n:
            tm = _round_up(n, 8)                       # single row tile
        else:
            # Cap tm so the row grid has >= 8 steps (feeds both v7x TCs and
            # keeps the DMA pipeline warm), but never below 128 rows.
            tm = min(512, _round_up(pl.cdiv(n, 8), 8))
            tm = max(tm, 128)
    else:
        tm = _round_up(max(8, min(block_rows, n)), 8)

    if block_k is None:
        tk = n if small_n else 512                     # 512 is a 128-multiple
    else:
        tk = n if block_k >= n else _round_up(block_k, 128)

    # Shrink tiles if the per-step working set would exceed the VMEM budget
    # (2x = double-buffered input/output blocks).
    def _vmem_est(tm_, tk_):
        return (2 * tm_ * tk_ * isize          # A tile
                + 2 * tk_ * din * isize        # X tile
                + 2 * din * dout * isize       # W^T (resident)
                + tm_ * dout * 4               # f32 accumulator scratch
                + 2 * tm_ * dout * 4)          # output tile

    while _vmem_est(tm, tk) > budget and (tk > 128 or tm > 128):
        if tk > 128 and tk >= tm:
            tk = max(128, tk // 2)
        else:
            tm = max(128, _round_up(tm // 2, 8))

    grid = (pl.cdiv(n, tm), pl.cdiv(n, tk))
    mask_k = (n % tk) != 0

    # Cast matmul inputs once (ideally A_hat is already stored in
    # compute_dtype upstream so this cast pass disappears entirely).
    a_c = a_hat if a_hat.dtype == compute_dtype else a_hat.astype(compute_dtype)
    x_c = x if x.dtype == compute_dtype else x.astype(compute_dtype)
    wt_c = weight.T.astype(compute_dtype)              # tiny: (Din, Dout)

    kernel = functools.partial(_gcn_kernel, n=n, tk=tk, mask_k=mask_k)

    out = pl.pallas_call(
        kernel,
        out_shape=jax.ShapeDtypeStruct((n, dout), jnp.float32),
        grid=grid,
        in_specs=[
            pl.BlockSpec((tm, tk), lambda i, k: (i, k)),      # A row/K tile
            pl.BlockSpec((tk, din), lambda i, k: (k, 0)),     # X K slab
            pl.BlockSpec((din, dout), lambda i, k: (0, 0)),   # W^T resident
        ],
        out_specs=pl.BlockSpec((tm, dout), lambda i, k: (i, 0)),
        scratch_shapes=[pltpu.VMEM((tm, dout), jnp.float32)],
        compiler_params=pltpu.CompilerParams(
            dimension_semantics=("parallel", "arbitrary"),
            vmem_limit_bytes=budget,
        ),
    )(a_c, x_c, wt_c)

    # TODO(synk): for large output_dim, pad Dout to a multiple of 128 inside the
    # kernel for lane-dense stores (not worth it at small Dout like 16).
    return out.astype(x.dtype)


def xavier_uniform(key, shape, gain):
    # shape = (fan_out, fan_in) for nn.Linear weight
    fan_out, fan_in = shape
    a = gain * jnp.sqrt(6.0 / (fan_in + fan_out))
    return jax.random.uniform(key, shape, minval=-a, maxval=a, dtype=jnp.float32)


if __name__ == "__main__":
    key = jax.random.PRNGKey(0)
    k_x, k_a, k_w = jax.random.split(key, 3)

    N, INPUT_DIM, OUTPUT_DIM = 200, 32, 16

    x = jax.random.normal(k_x, (N, INPUT_DIM), dtype=jnp.float32)
    # simple symmetric "normalized adjacency"-like matrix
    a_raw = jax.random.uniform(k_a, (N, N), dtype=jnp.float32)
    a_hat = (a_raw + a_raw.T) / (2.0 * N)

    # Deterministic xavier_uniform init with tanh gain (5/3), like init_weight()
    gain_tanh = 5.0 / 3.0
    weight = xavier_uniform(k_w, (OUTPUT_DIM, INPUT_DIM), gain_tanh)

    # Plain-JAX f32 reference of the PyTorch forward.
    ref = jnp.tanh(a_hat @ (x @ weight.T))
    ref = ref / jnp.maximum(
        jnp.sqrt(jnp.sum(ref * ref, axis=1, keepdims=True)), 1e-12)

    # 1) f32 compute, small-N single-tile fused path: exact semantics.
    out_f32 = jax.block_until_ready(
        gcn_forward(x, a_hat, weight, compute_dtype=jnp.float32))
    assert out_f32.shape == (N, OUTPUT_DIM)
    assert jnp.allclose(out_f32, ref, atol=1e-4, rtol=1e-4), "f32 mismatch"

    # 2) f32 compute, forced multi-tile grid (ragged row tile + masked ragged
    #    K tile): exercises the large-N / v7x-safe accumulator path.
    out_tiled = jax.block_until_ready(
        gcn_forward(x, a_hat, weight, compute_dtype=jnp.float32,
                    block_rows=64, block_k=128))
    assert jnp.allclose(out_tiled, ref, atol=1e-4, rtol=1e-4), "tiled mismatch"

    # 3) Default bf16 matmul inputs (halves A's HBM traffic); f32 accumulation.
    out_bf16 = jax.block_until_ready(gcn_forward(x, a_hat, weight))
    assert out_bf16.shape == (N, OUTPUT_DIM)
    assert jnp.allclose(out_bf16, ref, atol=4e-2, rtol=4e-2), "bf16 mismatch"

    print("KERNEL_OK")
</pallas_src>

<mosaic_0001>
module attributes {stable_mosaic.version = 11 : i64} {
  func.func @_gcn_kernel(%arg0: i32, %arg1: i32, %arg2: memref<200x200xf32, #tpu.memory_space<vmem>>, %arg3: memref<200x32xf32, #tpu.memory_space<vmem>>, %arg4: memref<32x16xf32, #tpu.memory_space<vmem>>, %arg5: memref<200x16xf32, #tpu.memory_space<vmem>>, %arg6: memref<200x16xf32, #tpu.memory_space<vmem>>) attributes {dimension_semantics = [#tpu.dimension_semantics<parallel>, #tpu.dimension_semantics<arbitrary>], iteration_bounds = array<i64: 1, 1>, scalar_prefetch = 0 : i64, scratch_operands = 1 : i64, tpu.core_type = #tpu.core_type<tc>, window_params = [{transform_indices = @transform_0, window_bounds = array<i64: 200, 200>}, {transform_indices = @transform_1, window_bounds = array<i64: 200, 32>}, {pipeline_mode = #tpu.pipeline_mode<synchronous>, transform_indices = @transform_2, window_bounds = array<i64: 32, 16>}, {transform_indices = @transform_3, window_bounds = array<i64: 200, 16>}]} {
    %c0_i32 = arith.constant 0 : i32
    %0 = arith.cmpi eq, %arg1, %c0_i32 : i32
    %1 = arith.extui %0 : i1 to i32
    %c0_i32_0 = arith.constant 0 : i32
    %2 = arith.cmpi ne, %1, %c0_i32_0 : i32
    scf.if %2 {
      %cst_13 = arith.constant 0.000000e+00 : f32
      %14 = vector.broadcast %cst_13 : f32 to vector<200x16xf32>
      %c0_14 = arith.constant 0 : index
      %c0_15 = arith.constant 0 : index
      %15 = vector.load %arg6[%c0_14, %c0_15] : memref<200x16xf32, #tpu.memory_space<vmem>>, vector<200x16xf32>
      tpu.vector_store %arg6[%c0_14, %c0_15], %14 {strides = array<i32>} : memref<200x16xf32, #tpu.memory_space<vmem>>, vector<200x16xf32>,
    } else {
    }
    %c0 = arith.constant 0 : index
    %c0_1 = arith.constant 0 : index
    %3 = vector.load %arg2[%c0, %c0_1] : memref<200x200xf32, #tpu.memory_space<vmem>>, vector<200x200xf32>
    %c0_2 = arith.constant 0 : index
    %c0_3 = arith.constant 0 : index
    %4 = vector.load %arg3[%c0_2, %c0_3] : memref<200x32xf32, #tpu.memory_space<vmem>>, vector<200x32xf32>
    %c0_4 = arith.constant 0 : index
    %c0_5 = arith.constant 0 : index
    %5 = vector.load %arg4[%c0_4, %c0_5] : memref<32x16xf32, #tpu.memory_space<vmem>>, vector<32x16xf32>
    %cst = arith.constant dense<0.000000e+00> : vector<200x16xf32>
    %6 = tpu.matmul %4, %5, %cst {dimension_numbers = #tpu.dot_dimension_numbers<[1], [0], [0], [1], [0, 0, 1, 1], [], []>} : vector<200x32xf32>, vector<32x16xf32>, vector<200x16xf32> -> vector<200x16xf32>
    %c0_6 = arith.constant 0 : index
    %c0_7 = arith.constant 0 : index
    %7 = vector.load %arg6[%c0_6, %c0_7] : memref<200x16xf32, #tpu.memory_space<vmem>>, vector<200x16xf32>
    %cst_8 = arith.constant dense<0.000000e+00> : vector<200x16xf32>
    %8 = tpu.matmul %3, %6, %cst_8 {dimension_numbers = #tpu.dot_dimension_numbers<[1], [0], [0], [1], [0, 0, 1, 1], [], []>} : vector<200x200xf32>, vector<200x16xf32>, vector<200x16xf32> -> vector<200x16xf32>
    %9 = arith.addf %7, %8 : vector<200x16xf32>
    %c0_9 = arith.constant 0 : index
    %c0_10 = arith.constant 0 : index
    %10 = vector.load %arg6[%c0_9, %c0_10] : memref<200x16xf32, #tpu.memory_space<vmem>>, vector<200x16xf32>
    tpu.vector_store %arg6[%c0_9, %c0_10], %9 {strides = array<i32>} : memref<200x16xf32, #tpu.memory_space<vmem>>, vector<200x16xf32>,
    %c0_i32_11 = arith.constant 0 : i32
    %11 = arith.cmpi eq, %arg1, %c0_i32_11 : i32
    %12 = arith.extui %11 : i1 to i32
    %c0_i32_12 = arith.constant 0 : i32
    %13 = arith.cmpi ne, %12, %c0_i32_12 : i32
    scf.if %13 {
      %c0_13 = arith.constant 0 : index
      %c0_14 = arith.constant 0 : index
      %14 = vector.load %arg6[%c0_13, %c0_14] : memref<200x16xf32, #tpu.memory_space<vmem>>, vector<200x16xf32>
      %15 = math.tanh %14 : vector<200x16xf32>
      %16 = arith.mulf %15, %15 : vector<200x16xf32>
      %cst_15 = arith.constant dense<0.000000e+00> : vector<200xf32>
      %17 = vector.multi_reduction <add>, %16, %cst_15 [1] : vector<200x16xf32> to vector<200xf32>
      %18 = vector.shape_cast %17 : vector<200xf32> to vector<200x1xf32>
      %cst_16 = arith.constant 1.000000e-24 : f32
      %19 = vector.broadcast %cst_16 : f32 to vector<200x1xf32>
      %20 = arith.maximumf %18, %19 : vector<200x1xf32>
      %21 = math.rsqrt %20 : vector<200x1xf32>
      %22 = vector.broadcast %21 : vector<200x1xf32> to vector<200x16xf32>
      %23 = arith.mulf %15, %22 : vector<200x16xf32>
      %c0_17 = arith.constant 0 : index
      %c0_18 = arith.constant 0 : index
      %24 = vector.load %arg5[%c0_17, %c0_18] : memref<200x16xf32, #tpu.memory_space<vmem>>, vector<200x16xf32>
      tpu.vector_store %arg5[%c0_17, %c0_18], %23 {strides = array<i32>} : memref<200x16xf32, #tpu.memory_space<vmem>>, vector<200x16xf32>,
    } else {
    }
    return
  }
  func.func @transform_0(%arg0: i32, %arg1: i32) -> (i32, i32) {
    %c0_i32 = arith.constant 0 : i32
    return %arg0, %arg1 : i32, i32
  }
  func.func @transform_1(%arg0: i32, %arg1: i32) -> (i32, i32) {
    %c0_i32 = arith.constant 0 : i32
    %c0_i32_0 = arith.constant 0 : i32
    return %arg1, %c0_i32 : i32, i32
  }
  func.func @transform_2(%arg0: i32, %arg1: i32) -> (i32, i32) {
    %c0_i32 = arith.constant 0 : i32
    %c0_i32_0 = arith.constant 0 : i32
    %c0_i32_1 = arith.constant 0 : i32
    return %c0_i32, %c0_i32_0 : i32, i32
  }
  func.func @transform_3(%arg0: i32, %arg1: i32) -> (i32, i32) {
    %c0_i32 = arith.constant 0 : i32
    %c0_i32_0 = arith.constant 0 : i32
    return %arg0, %c0_i32 : i32, i32
  }
}

</mosaic_0001>

<bundles_post_ra>
// kernel: tpu_custom_call.1
= control target key start
LH: loop header
LB: loop body
LE: loop exit
PB: predicated region body
PF: predicated region fallthrough
CT: control target
= control target key end

     0   :  { %8 = vsyncpa [#allocation4], 0  ;;  %s1363_s12 = smov [#allocation3]   ;;  %s1941_s0 = inlined_call_operand.hbm [shape: f32[200,200], index: 0, kind: input, shape index: {}]   ;;  %s1942_s1 = inlined_call_operand.vmem [shape: f32[200,32], index: 1, kind: input, shape index: {}]   ;;  %s1943_s2 = inlined_call_operand.vmem [shape: f32[32,16], index: 2, kind: input, shape index: {}]   ;;  %s1944_s3 = inlined_call_operand.vmem [shape: f32[200,16], index: 3, kind: output, shape index: {}]  }
   0x1   :  { %s14_s13 = sshll.u32 %s1363_s12, 4  ;;  %s1339_s16 = scalar_lea.hbm %s1941_s0, 6400  ;;  %s15_s13 = int_to_ptr.vmem [resolvable:$true] %s14_s13 }
   0x2   :  { %p1340_p0 = scmp.ne.s32.totalorder %s1941_s0, %s1339_s16  ;;  %p1343_p1 = scmp.lt.u32.totalorder %s1339_s16, %s1941_s0 }
   0x4   :  { %p1345_p2 = pnand %p1343_p1, %p1340_p0 }
   0x6   :  { %1348 = shalt.err (!%p1345_p2)
}
   0x7   :  { %s1349_s21 = scalar_lea.vmem %s15_s13, 6400  ;;  %p1354_p4 = scmp.lt.s32.totalorder %s15_s13, %s15_s13 }
   0x8   :  { %p1350_p3 = scmp.ne.s32.totalorder %s15_s13, %s1349_s21  ;;  %p1355_p5 = scmp.lt.s32.totalorder %s1349_s21, %s1349_s21 }
   0xa   :  { %p1356_p6 = por %p1355_p5, %p1354_p4 }
   0xc   :  { %p1357_p7 = pnand %p1356_p6, %p1350_p3 }
   0xe   :  { %1360 = shalt.err (!%p1357_p7)
}
   0xf   :  { %s1364_s22 = smov 256   ;;  %s1365_s23 = smov 16  }
  0x10   :  { %20 = dma.hbm_to_vmem [thread:$0]  %s1941_s0, 6400, %s15_s13, [#allocation4], %s1364_s22, %s1364_s22, %s1365_s23  }
  0x11   :  { %1361 = dma.done.wait [#allocation4], 6400  }
  0x12   :  { %1362 = vsyncadd [#allocation4], 4294960896  ;;  %v1366_v0 = vmov 0.0|0.0   ;;  %vm1367_vm0 = vmmov 0   ;;  %v1368_v1 = vmov 0.0   ;;  %v133_v2 = vld [vmem:[%s1943_s2] sm:$0xff] }
  0x13   :  { %1165 = vmatprep.subr.bf16.mxu0 %v1366_v0  ;;  %1090 = vmatprep.mubr.msk.f32.mxu0 %vm1367_vm0, %v1368_v1  ;;  %v134_v3 = vld [vmem:[%s1943_s2 + $0x8] sm:$0xff]  ;;  %v135_v4 = vld [vmem:[%s1943_s2 + $0x10] sm:$0xff]  ;;  %v136_v6 = vld [vmem:[%s1943_s2 + $0x18] sm:$0xff]  ;;  %vm137_vm1 = vcmask 261120   ;;  %vm428_vm2 = vcmask 588800   ;;  %vm32_vm3 = vcmask 130048  }
  0x14   :  { %1207 = vmatprep.subr.bf16.mxu1 %v1366_v0  ;;  %v1166_v5 = vpack.c.bf16 %v134_v3, %v133_v2  ;;  %v1169_v7 = vpack.c.bf16 %v136_v6, %v135_v4  ;;  %v108_v8 = vld [vmem:[%s1942_s1] sm:$0xff]  ;;  %v109_v9 = vld [vmem:[%s1942_s1 + $0x8] sm:$0xff]  ;;  %v110_v10 = vld [vmem:[%s1942_s1 + $0x10] sm:$0xff]  ;;  %33 = vst.msk [vmem:[#allocation2] sm:$0xff] %vm32_vm3, %v1368_v1 }
  0x15   :  { %v111_v11 = vld [vmem:[%s1942_s1 + $0x18] sm:$0xff]  ;;  %v112_v12 = vld [vmem:[%s1942_s1 + $0x20] sm:$0xff]  ;;  %v113_v13 = vld [vmem:[%s1942_s1 + $0x28] sm:$0xff]  ;;  %34 = vst.msk [vmem:[#allocation2 + $0x8] sm:$0xff] %vm32_vm3, %v1368_v1 }
  0x16   :  { %1167 = vmatpush3.bf16.msra.mxu0 %v1166_v5  ;;  %v114_v14 = vld [vmem:[%s1942_s1 + $0x30] sm:$0xff]  ;;  %v115_v15 = vld [vmem:[%s1942_s1 + $0x38] sm:$0xff]  ;;  %v116_v16 = vld [vmem:[%s1942_s1 + $0x40] sm:$0xff]  ;;  %35 = vst.msk [vmem:[#allocation2 + $0x10] sm:$0xff] %vm32_vm3, %v1368_v1 }
  0x17   :  { %1168 = vmatprep.subr.bf16.mxu0 %v1366_v0  ;;  %v117_v17 = vld [vmem:[%s1942_s1 + $0x48] sm:$0xff]  ;;  %v118_v18 = vld [vmem:[%s1942_s1 + $0x50] sm:$0xff]  ;;  %v119_v19 = vld [vmem:[%s1942_s1 + $0x58] sm:$0xff]  ;;  %36 = vst.msk [vmem:[#allocation2 + $0x18] sm:$0xff] %vm32_vm3, %v1368_v1 }
  0x18   :  { %v120_v20 = vld [vmem:[%s1942_s1 + $0x60] sm:$0xff]  ;;  %v121_v21 = vld [vmem:[%s1942_s1 + $0x68] sm:$0xff]  ;;  %v122_v22 = vld [vmem:[%s1942_s1 + $0x70] sm:$0xff]  ;;  %37 = vst.msk [vmem:[#allocation2 + $0x20] sm:$0xff] %vm32_vm3, %v1368_v1 }
  0x19   :  { %v123_v23 = vld [vmem:[%s1942_s1 + $0x78] sm:$0xff]  ;;  %v124_v24 = vld [vmem:[%s1942_s1 + $0x80] sm:$0xff]  ;;  %v125_v25 = vld [vmem:[%s1942_s1 + $0x88] sm:$0xff]  ;;  %38 = vst.msk [vmem:[#allocation2 + $0x28] sm:$0xff] %vm32_vm3, %v1368_v1 }
  0x1a   :  { %1170 = vmatpush3.bf16.msra.mxu0 %v1169_v7  ;;  %v126_v26 = vld [vmem:[%s1942_s1 + $0x90] sm:$0xff]  ;;  %v127_v27 = vld [vmem:[%s1942_s1 + $0x98] sm:$0xff]  ;;  %v128_v28 = vld [vmem:[%s1942_s1 + $0xa0] sm:$0xff]  ;;  %39 = vst.msk [vmem:[#allocation2 + $0x30] sm:$0xff] %vm32_vm3, %v1368_v1 }
  0x1b   :  { %1171 = vmatprep.subr.bf16.mxu0 %v1366_v0  ;;  %v129_v29 = vld [vmem:[%s1942_s1 + $0xa8] sm:$0xff]  ;;  %v130_v30 = vld [vmem:[%s1942_s1 + $0xb0] sm:$0xff]  ;;  %v131_v31 = vld [vmem:[%s1942_s1 + $0xb8] sm:$0xff]  ;;  %40 = vst.msk [vmem:[#allocation2 + $0x38] sm:$0xff] %vm32_vm3, %v1368_v1 }
  0x1c   :  { %v132_v32 = vld [vmem:[%s1942_s1 + $0xc0] sm:$0xff]  ;;  %v59_v33 = vld [vmem:[#allocation3 + $0x8] sm:$0xff]  ;;  %41 = vst.msk [vmem:[#allocation2 + $0x40] sm:$0xff] %vm32_vm3, %v1368_v1  ;;  %42 = vst.msk [vmem:[#allocation2 + $0x48] sm:$0xff] %vm32_vm3, %v1368_v1 }
  0x1d   :  { %1091 = vmatmul.mubr.msk.f32.vlgmr.msra.gmra.mrb[0].mxu0 %vm137_vm1, %v108_v8  ;;  %v69_v34 = vld [vmem:[#allocation3 + $0x58] sm:$0xff]  ;;  %43 = vst.msk [vmem:[#allocation2 + $0x50] sm:$0xff] %vm32_vm3, %v1368_v1  ;;  %44 = vst.msk [vmem:[#allocation2 + $0x58] sm:$0xff] %vm32_vm3, %v1368_v1 }
  0x1e   :  { %1093 = vmatprep.mubr.msk.f32.mxu0 %vm1367_vm0, %v1368_v1  ;;  %1033 = vmatprep.mubr.msk.f32.mxu1 %vm428_vm2, %v69_v34  ;;  %45 = vst.msk [vmem:[#allocation2 + $0x60] sm:$0xff] %vm32_vm3, %v1368_v1  ;;  %46 = vst.msk [vmem:[#allocation2 + $0x68] sm:$0xff] %vm32_vm3, %v1368_v1 }
  0x1f   :  { %47 = vst.msk [vmem:[#allocation2 + $0x70] sm:$0xff] %vm32_vm3, %v1368_v1  ;;  %48 = vst.msk [vmem:[#allocation2 + $0x78] sm:$0xff] %vm32_vm3, %v1368_v1 }
  0x20   :  { %49 = vst.msk [vmem:[#allocation2 + $0x80] sm:$0xff] %vm32_vm3, %v1368_v1  ;;  %50 = vst.msk [vmem:[#allocation2 + $0x88] sm:$0xff] %vm32_vm3, %v1368_v1 }
  0x21   :  { %1094 = vmatmul.mubr.msk.f32.gmra.mrb[2].mxu0 %vm137_vm1, %v109_v9  ;;  %51 = vst.msk [vmem:[#allocation2 + $0x90] sm:$0xff] %vm32_vm3, %v1368_v1  ;;  %52 = vst.msk [vmem:[#allocation2 + $0x98] sm:$0xff] %vm32_vm3, %v1368_v1 }
  0x22   :  { %1096 = vmatprep.mubr.msk.f32.mxu0 %vm1367_vm0, %v1368_v1  ;;  %53 = vst.msk [vmem:[#allocation2 + $0xa0] sm:$0xff] %vm32_vm3, %v1368_v1  ;;  %54 = vst.msk [vmem:[#allocation2 + $0xa8] sm:$0xff] %vm32_vm3, %v1368_v1 }
  0x23   :  { %55 = vst.msk [vmem:[#allocation2 + $0xb0] sm:$0xff] %vm32_vm3, %v1368_v1  ;;  %56 = vst.msk [vmem:[#allocation2 + $0xb8] sm:$0xff] %vm32_vm3, %v1368_v1 }
  0x24   :  { %57 = vst.msk [vmem:[#allocation2 + $0xc0] sm:$0xff] %vm32_vm3, %v1368_v1 }
  0x25   :  { %1097 = vmatmul.mubr.msk.f32.gmra.mrb[4].mxu0 %vm137_vm1, %v110_v10 }
  0x26   :  { %1099 = vmatprep.mubr.msk.f32.mxu0 %vm1367_vm0, %v1368_v1 }
  0x29   :  { %1100 = vmatmul.mubr.msk.f32.gmra.mrb[6].mxu0 %vm137_vm1, %v111_v11 }
  0x2a   :  { %1102 = vmatprep.mubr.msk.f32.mxu0 %vm1367_vm0, %v1368_v1 }
  0x2d   :  { %1103 = vmatmul.mubr.msk.f32.gmra.mrb[8].mxu0 %vm137_vm1, %v112_v12 }
  0x2e   :  { %1105 = vmatprep.mubr.msk.f32.mxu0 %vm1367_vm0, %v1368_v1 }
  0x31   :  { %1106 = vmatmul.mubr.msk.f32.gmra.mrb[10].mxu0 %vm137_vm1, %v113_v13 }
  0x32   :  { %1108 = vmatprep.mubr.msk.f32.mxu0 %vm1367_vm0, %v1368_v1 }
  0x35   :  { %1109 = vmatmul.mubr.msk.f32.gmra.mrb[12].mxu0 %vm137_vm1, %v114_v14 }
  0x36   :  { %1111 = vmatprep.mubr.msk.f32.mxu0 %vm1367_vm0, %v1368_v1 }
  0x39   :  { %1112 = vmatmul.mubr.msk.f32.gmra.mrb[14].mxu0 %vm137_vm1, %v115_v15 }
  0x3a   :  { %1114 = vmatprep.mubr.msk.f32.mxu0 %vm1367_vm0, %v1368_v1 }
  0x3d   :  { %1115 = vmatmul.mubr.msk.f32.gmra.mrb[16].mxu0 %vm137_vm1, %v116_v16 }
  0x3e   :  { %1117 = vmatprep.mubr.msk.f32.mxu0 %vm1367_vm0, %v1368_v1 }
  0x41   :  { %1118 = vmatmul.mubr.msk.f32.gmra.mrb[18].mxu0 %vm137_vm1, %v117_v17 }
  0x42   :  { %1120 = vmatprep.mubr.msk.f32.mxu0 %vm1367_vm0, %v1368_v1 }
  0x45   :  { %1121 = vmatmul.mubr.msk.f32.gmra.mrb[20].mxu0 %vm137_vm1, %v118_v18 }
  0x46   :  { %1123 = vmatprep.mubr.msk.f32.mxu0 %vm1367_vm0, %v1368_v1 }
  0x49   :  { %1124 = vmatmul.mubr.msk.f32.gmra.mrb[22].mxu0 %vm137_vm1, %v119_v19 }
  0x4a   :  { %1126 = vmatprep.mubr.msk.f32.mxu0 %vm1367_vm0, %v1368_v1 }
  0x4d   :  { %1127 = vmatmul.mubr.msk.f32.gmra.mrb[24].mxu0 %vm137_vm1, %v120_v20 }
  0x4e   :  { %1129 = vmatprep.mubr.msk.f32.mxu0 %vm1367_vm0, %v1368_v1 }
  0x51   :  { %1130 = vmatmul.mubr.msk.f32.gmra.mrb[26].mxu0 %vm137_vm1, %v121_v21 }
  0x52   :  { %1132 = vmatprep.mubr.msk.f32.mxu0 %vm1367_vm0, %v1368_v1 }
  0x55   :  { %1133 = vmatmul.mubr.msk.f32.gmra.mrb[28].mxu0 %vm137_vm1, %v122_v22 }
  0x56   :  { %1135 = vmatprep.mubr.msk.f32.mxu0 %vm1367_vm0, %v1368_v1 }
  0x59   :  { %1136 = vmatmul.mubr.msk.f32.gmra.mrb[30].mxu0 %vm137_vm1, %v123_v23 }
  0x5a   :  { %1138 = vmatprep.mubr.msk.f32.mxu0 %vm1367_vm0, %v1368_v1 }
  0x5d   :  { %1139 = vmatmul.mubr.msk.f32.gmra.mrb[32].mxu0 %vm137_vm1, %v124_v24 }
  0x5e   :  { %1141 = vmatprep.mubr.msk.f32.mxu0 %vm1367_vm0, %v1368_v1 }
  0x61   :  { %1142 = vmatmul.mubr.msk.f32.gmra.mrb[34].mxu0 %vm137_vm1, %v125_v25 }
  0x62   :  { %1144 = vmatprep.mubr.msk.f32.mxu0 %vm1367_vm0, %v1368_v1 }
  0x65   :  { %1145 = vmatmul.mubr.msk.f32.gmra.mrb[36].mxu0 %vm137_vm1, %v126_v26 }
  0x66   :  { %1147 = vmatprep.mubr.msk.f32.mxu0 %vm1367_vm0, %v1368_v1 }
  0x69   :  { %1148 = vmatmul.mubr.msk.f32.gmra.mrb[38].mxu0 %vm137_vm1, %v127_v27 }
  0x6a   :  { %1150 = vmatprep.mubr.msk.f32.mxu0 %vm1367_vm0, %v1368_v1 }
  0x6d   :  { %1151 = vmatmul.mubr.msk.f32.gmra.mrb[40].mxu0 %vm137_vm1, %v128_v28 }
  0x6e   :  { %1153 = vmatprep.mubr.msk.f32.mxu0 %vm1367_vm0, %v1368_v1 }
  0x71   :  { %1154 = vmatmul.mubr.msk.f32.gmra.mrb[42].mxu0 %vm137_vm1, %v129_v29 }
  0x72   :  { %1156 = vmatprep.mubr.msk.f32.mxu0 %vm1367_vm0, %v1368_v1 }
  0x75   :  { %1157 = vmatmul.mubr.msk.f32.gmra.mrb[44].mxu0 %vm137_vm1, %v130_v30 }
  0x76   :  { %1159 = vmatprep.mubr.msk.f32.mxu0 %vm1367_vm0, %v1368_v1 }
  0x79   :  { %1160 = vmatmul.mubr.msk.f32.gmra.mrb[46].mxu0 %vm137_vm1, %v131_v31 }
  0x7a   :  { %1162 = vmatprep.mubr.msk.f32.mxu0 %vm1367_vm0, %v1368_v1 }
  0x7d   :  { %1163 = vmatmul.mubr.msk.f32.gmra.mrb[48].mxu0 %vm137_vm1, %v132_v32 }
  0x7e   :  { %1028 = vmatprep.mubr.msk.f32.mxu0 %vm428_vm2, %v59_v33 }
  0xf0   :  { %v279_v35 = vpop.f32.mrb[0].mxu0 }
  0xf1   :  { %v1092_v36 = vpop.f32.mrb[1].mxu0 }
  0xf2   :  { %v68_v36 = vld [vmem:[#allocation3 + $0x50] sm:$0xff] }
  0xf4   :  { %v284_v37 = vpop.f32.mrb[2].mxu0 }
  0xf5   :  { %v1172_v38 = vpack.c.bf16 %v284_v37, %v279_v35  ;;  %v1095_v39 = vpop.f32.mrb[3].mxu0  ;;  %v58_v35 = vld [vmem:[#allocation3] sm:$0xff]  ;;  %v61_v37 = vld [vmem:[#allocation3 + $0x18] sm:$0xff] }
  0xf6   :  { %v70_v39 = vld [vmem:[#allocation3 + $0x60] sm:$0xff] }
  0xf7   :  { %1173 = vmatpush1.bf16.msra.mxu0 %v1172_v38  ;;  %1220 = vmatpush1.bf16.msra.mxu1 %v1172_v38  ;;  %v71_v38 = vld [vmem:[#allocation3 + $0x68] sm:$0xff] }
  0xf8   :  { %v289_v40 = vpop.f32.mrb[4].mxu0  ;;  %1174 = vmatprep.subr.bf16.mxu0 %v1366_v0  ;;  %1208 = vmatprep.subr.bf16.mxu1 %v1366_v0 }
  0xf9   :  { %v1098_v41 = vpop.f32.mrb[5].mxu0 }
  0xfa   :  { %v73_v41 = vld [vmem:[#allocation3 + $0x78] sm:$0xff] }
  0xfc   :  { %v294_v42 = vpop.f32.mrb[6].mxu0 }
  0xfd   :  { %v1175_v43 = vpack.c.bf16 %v294_v42, %v289_v40  ;;  %v1101_v44 = vpop.f32.mrb[7].mxu0  ;;  %v63_v40 = vld [vmem:[#allocation3 + $0x28] sm:$0xff]  ;;  %v72_v42 = vld [vmem:[#allocation3 + $0x70] sm:$0xff] }
  0xfe   :  { %v75_v44 = vld [vmem:[#allocation3 + $0x88] sm:$0xff] }
  0xff   :  { %1176 = vmatpush1.bf16.msra.mxu0 %v1175_v43  ;;  %1221 = vmatpush1.bf16.msra.mxu1 %v1175_v43  ;;  %v65_v43 = vld [vmem:[#allocation3 + $0x38] sm:$0xff] }
 0x100   :  { %v299_v45 = vpop.f32.mrb[8].mxu0  ;;  %1177 = vmatprep.subr.bf16.mxu0 %v1366_v0  ;;  %1209 = vmatprep.subr.bf16.mxu1 %v1366_v0 }
 0x101   :  { %v1104_v46 = vpop.f32.mrb[9].mxu0 }
 0x102   :  { %v74_v46 = vld [vmem:[#allocation3 + $0x80] sm:$0xff] }
 0x104   :  { %v304_v47 = vpop.f32.mrb[10].mxu0 }
 0x105   :  { %v1178_v48 = vpack.c.bf16 %v304_v47, %v299_v45  ;;  %v1107_v49 = vpop.f32.mrb[11].mxu0  ;;  %v64_v45 = vld [vmem:[#allocation3 + $0x30] sm:$0xff]  ;;  %v67_v47 = vld [vmem:[#allocation3 + $0x48] sm:$0xff] }
 0x106   :  { %v66_v49 = vld [vmem:[#allocation3 + $0x40] sm:$0xff] }
 0x107   :  { %1179 = vmatpush1.bf16.msra.mxu0 %v1178_v48  ;;  %1222 = vmatpush1.bf16.msra.mxu1 %v1178_v48  ;;  %v77_v48 = vld [vmem:[#allocation3 + $0x98] sm:$0xff] }
 0x108   :  { %v309_v50 = vpop.f32.mrb[12].mxu0  ;;  %1180 = vmatprep.subr.bf16.mxu0 %v1366_v0  ;;  %1210 = vmatprep.subr.bf16.mxu1 %v1366_v0 }
 0x109   :  { %v1110_v51 = vpop.f32.mrb[13].mxu0 }
 0x10a   :  { %v79_v51 = vld [vmem:[#allocation3 + $0xa8] sm:$0xff] }
 0x10c   :  { %v314_v52 = vpop.f32.mrb[14].mxu0 }
 0x10d   :  { %v1181_v53 = vpack.c.bf16 %v314_v52, %v309_v50  ;;  %v1113_v54 = vpop.f32.mrb[15].mxu0  ;;  %v76_v50 = vld [vmem:[#allocation3 + $0x90] sm:$0xff]  ;;  %v78_v52 = vld [vmem:[#allocation3 + $0xa0] sm:$0xff] }
 0x10e   :  { %v80_v54 = vld [vmem:[#allocation3 + $0xb0] sm:$0xff] }
 0x10f   :  { %1182 = vmatpush1.bf16.msra.mxu0 %v1181_v53  ;;  %1223 = vmatpush1.bf16.msra.mxu1 %v1181_v53  ;;  %v81_v53 = vld [vmem:[#allocation3 + $0xb8] sm:$0xff] }
 0x110   :  { %v319_v55 = vpop.f32.mrb[16].mxu0  ;;  %1183 = vmatprep.subr.bf16.mxu0 %v1366_v0  ;;  %1211 = vmatprep.subr.bf16.mxu1 %v1366_v0 }
 0x111   :  { %v1116_v56 = vpop.f32.mrb[17].mxu0 }
 0x112   :  { %v82_v56 = vld [vmem:[#allocation3 + $0xc0] sm:$0xff] }
 0x114   :  { %v324_v57 = vpop.f32.mrb[18].mxu0 }
 0x115   :  { %v1184_v58 = vpack.c.bf16 %v324_v57, %v319_v55  ;;  %v1119_v59 = vpop.f32.mrb[19].mxu0  ;;  %v83_v55 = vld [vmem:[#allocation3 + $0xc8] sm:$0xff]  ;;  %v85_v57 = vld [vmem:[#allocation3 + $0xd8] sm:$0xff] }
 0x116   :  { %v87_v59 = vld [vmem:[#allocation3 + $0xe8] sm:$0xff] }
 0x117   :  { %1185 = vmatpush1.bf16.msra.mxu0 %v1184_v58  ;;  %1224 = vmatpush1.bf16.msra.mxu1 %v1184_v58  ;;  %v84_v58 = vld [vmem:[#allocation3 + $0xd0] sm:$0xff] }
 0x118   :  { %v329_v60 = vpop.f32.mrb[20].mxu0  ;;  %1186 = vmatprep.subr.bf16.mxu0 %v1366_v0  ;;  %1212 = vmatprep.subr.bf16.mxu1 %v1366_v0 }
 0x119   :  { %v1122_v61 = vpop.f32.mrb[21].mxu0 }
 0x11a   :  { %v89_v61 = vld [vmem:[#allocation3 + $0xf8] sm:$0xff] }
 0x11c   :  { %v334_v62 = vpop.f32.mrb[22].mxu0 }
 0x11d   :  { %v1187_v63 = vpack.c.bf16 %v334_v62, %v329_v60  ;;  %v1125_v2 = vpop.f32.mrb[23].mxu0  ;;  %v86_v60 = vld [vmem:[#allocation3 + $0xe0] sm:$0xff]  ;;  %v88_v62 = vld [vmem:[#allocation3 + $0xf0] sm:$0xff] }
 0x11e   :  { %v90_v2 = vld [vmem:[#allocation3 + $0x100] sm:$0xff] }
 0x11f   :  { %1188 = vmatpush1.bf16.msra.mxu0 %v1187_v63  ;;  %1225 = vmatpush1.bf16.msra.mxu1 %v1187_v63  ;;  %v91_v63 = vld [vmem:[#allocation3 + $0x108] sm:$0xff] }
 0x120   :  { %v339_v3 = vpop.f32.mrb[24].mxu0  ;;  %1189 = vmatprep.subr.bf16.mxu0 %v1366_v0  ;;  %1213 = vmatprep.subr.bf16.mxu1 %v1366_v0 }
 0x121   :  { %v1128_v4 = vpop.f32.mrb[25].mxu0 }
 0x122   :  { %v92_v4 = vld [vmem:[#allocation3 + $0x110] sm:$0xff] }
 0x124   :  { %v344_v5 = vpop.f32.mrb[26].mxu0 }
 0x125   :  { %v1190_v6 = vpack.c.bf16 %v344_v5, %v339_v3  ;;  %v1131_v7 = vpop.f32.mrb[27].mxu0  ;;  %v93_v3 = vld [vmem:[#allocation3 + $0x118] sm:$0xff]  ;;  %v95_v5 = vld [vmem:[#allocation3 + $0x128] sm:$0xff] }
 0x126   :  { %v97_v7 = vld [vmem:[#allocation3 + $0x138] sm:$0xff] }
 0x127   :  { %1191 = vmatpush1.bf16.msra.mxu0 %v1190_v6  ;;  %1226 = vmatpush1.bf16.msra.mxu1 %v1190_v6  ;;  %v94_v6 = vld [vmem:[#allocation3 + $0x120] sm:$0xff] }
 0x128   :  { %v349_v8 = vpop.f32.mrb[28].mxu0  ;;  %1192 = vmatprep.subr.bf16.mxu0 %v1366_v0  ;;  %1214 = vmatprep.subr.bf16.mxu1 %v1366_v0 }
 0x129   :  { %v1134_v9 = vpop.f32.mrb[29].mxu0 }
 0x12a   :  { %v99_v9 = vld [vmem:[#allocation3 + $0x148] sm:$0xff] }
 0x12c   :  { %v354_v10 = vpop.f32.mrb[30].mxu0 }
 0x12d   :  { %v1193_v11 = vpack.c.bf16 %v354_v10, %v349_v8  ;;  %v1137_v12 = vpop.f32.mrb[31].mxu0  ;;  %v96_v8 = vld [vmem:[#allocation3 + $0x130] sm:$0xff]  ;;  %v98_v10 = vld [vmem:[#allocation3 + $0x140] sm:$0xff] }
 0x12e   :  { %v100_v12 = vld [vmem:[#allocation3 + $0x150] sm:$0xff] }
 0x12f   :  { %1194 = vmatpush1.bf16.msra.mxu0 %v1193_v11  ;;  %1227 = vmatpush1.bf16.msra.mxu1 %v1193_v11  ;;  %v101_v11 = vld [vmem:[#allocation3 + $0x158] sm:$0xff] }
 0x130   :  { %v359_v13 = vpop.f32.mrb[32].mxu0  ;;  %1195 = vmatprep.subr.bf16.mxu0 %v1366_v0  ;;  %1215 = vmatprep.subr.bf16.mxu1 %v1366_v0 }
 0x131   :  { %v1140_v14 = vpop.f32.mrb[33].mxu0 }
 0x132   :  { %v102_v14 = vld [vmem:[#allocation3 + $0x160] sm:$0xff] }
 0x134   :  { %v364_v15 = vpop.f32.mrb[34].mxu0 }
 0x135   :  { %v1196_v16 = vpack.c.bf16 %v364_v15, %v359_v13  ;;  %v1143_v17 = vpop.f32.mrb[35].mxu0  ;;  %v103_v13 = vld [vmem:[#allocation3 + $0x168] sm:$0xff]  ;;  %v105_v15 = vld [vmem:[#allocation3 + $0x178] sm:$0xff] }
 0x136   :  { %v107_v17 = vld [vmem:[#allocation3 + $0x188] sm:$0xff] }
 0x137   :  { %1197 = vmatpush1.bf16.msra.mxu0 %v1196_v16  ;;  %1228 = vmatpush1.bf16.msra.mxu1 %v1196_v16  ;;  %v104_v16 = vld [vmem:[#allocation3 + $0x170] sm:$0xff] }
 0x138   :  { %v369_v18 = vpop.f32.mrb[36].mxu0  ;;  %1198 = vmatprep.subr.bf16.mxu0 %v1366_v0  ;;  %1216 = vmatprep.subr.bf16.mxu1 %v1366_v0 }
 0x139   :  { %v1146_v19 = vpop.f32.mrb[37].mxu0 }
 0x13a   :  { %v403_v19 = vld [vmem:[#allocation2] sm:$0xff] }
 0x13c   :  { %v374_v20 = vpop.f32.mrb[38].mxu0 }
 0x13d   :  { %v1199_v21 = vpack.c.bf16 %v374_v20, %v369_v18  ;;  %v1149_v22 = vpop.f32.mrb[39].mxu0  ;;  %v106_v18 = vld [vmem:[#allocation3 + $0x180] sm:$0xff] }
 0x13e   :  { %v408_v20 = vld [vmem:[#allocation2 + $0x28] sm:$0xff] }
 0x13f   :  { %1200 = vmatpush1.bf16.msra.mxu0 %v1199_v21  ;;  %1229 = vmatpush1.bf16.msra.mxu1 %v1199_v21 }
 0x140   :  { %v379_v23 = vpop.f32.mrb[40].mxu0  ;;  %1201 = vmatprep.subr.bf16.mxu0 %v1366_v0  ;;  %1217 = vmatprep.subr.bf16.mxu1 %v1366_v0 }
 0x141   :  { %v1152_v24 = vpop.f32.mrb[41].mxu0 }
 0x144   :  { %v384_v25 = vpop.f32.mrb[42].mxu0 }
 0x145   :  { %v1202_v26 = vpack.c.bf16 %v384_v25, %v379_v23  ;;  %v1155_v27 = vpop.f32.mrb[43].mxu0 }
 0x146   :  { %v404_v27 = vld [vmem:[#allocation2 + $0x8] sm:$0xff] }
 0x147   :  { %1203 = vmatpush1.bf16.msra.mxu0 %v1202_v26  ;;  %1230 = vmatpush1.bf16.msra.mxu1 %v1202_v26 }
 0x148   :  { %v389_v28 = vpop.f32.mrb[44].mxu0  ;;  %1204 = vmatprep.subr.bf16.mxu0 %v1366_v0  ;;  %1218 = vmatprep.subr.bf16.mxu1 %v1366_v0  ;;  %v60_v0 = vld [vmem:[#allocation3 + $0x10] sm:$0xff] }
 0x149   :  { %v1158_v29 = vpop.f32.mrb[45].mxu0 }
 0x14c   :  { %v394_v30 = vpop.f32.mrb[46].mxu0 }
 0x14d   :  { %v1205_v31 = vpack.c.bf16 %v394_v30, %v389_v28  ;;  %v1161_v32 = vpop.f32.mrb[47].mxu0  ;;  %v409_v28 = vld [vmem:[#allocation2 + $0x30] sm:$0xff] }
 0x14f   :  { %1206 = vmatpush1.bf16.msra.mxu0 %v1205_v31  ;;  %1231 = vmatpush1.bf16.msra.mxu1 %v1205_v31 }
 0x150   :  { %v399_v33 = vpop.f32.mrb[48].mxu0  ;;  %552 = vmatprep.subr.mxu0 %v1368_v1  ;;  %1219 = vmatprep.subr.mxu1 %v1368_v1  ;;  %v62_v1 = vld [vmem:[#allocation3 + $0x20] sm:$0xff] }
 0x151   :  { %v1164_v34 = vpop.f32.mrb[49].mxu0 }
 0x153   :  { %553 = vmatpush1.msra.mxu0 %v399_v33  ;;  %1232 = vmatpush1.msra.mxu1 %v399_v33 }
 0x154   :  { %569 = vmatmul.mubr.f32.vlgmr.msra.gmra.mrb[50].mxu0 %v58_v35  ;;  %594 = vmatmul.mubr.f32.vlgmr.msra.gmra.mrb[0].mxu1 %v68_v36  ;;  %v405_v35 = vld [vmem:[#allocation2 + $0x10] sm:$0xff]  ;;  %v410_v36 = vld [vmem:[#allocation2 + $0x38] sm:$0xff] }
 0x155   :  { %1029 = vmatprep.mubr.msk.f32.mxu0 %vm428_vm2, %v61_v37  ;;  %1034 = vmatprep.mubr.msk.f32.mxu1 %vm428_vm2, %v71_v38 }
 0x158   :  { %574 = vmatmul.mubr.f32.gmra.mrb[52].mxu0 %v60_v0  ;;  %599 = vmatmul.mubr.f32.gmra.mrb[2].mxu1 %v70_v39 }
 0x159   :  { %1030 = vmatprep.mubr.msk.f32.mxu0 %vm428_vm2, %v63_v40  ;;  %1035 = vmatprep.mubr.msk.f32.mxu1 %vm428_vm2, %v73_v41  ;;  %v411_v41 = vld [vmem:[#allocation2 + $0x40] sm:$0xff] }
 0x15c   :  { %579 = vmatmul.mubr.f32.gmra.mrb[54].mxu0 %v62_v1  ;;  %604 = vmatmul.mubr.f32.gmra.mrb[4].mxu1 %v72_v42  ;;  %v406_v42 = vld [vmem:[#allocation2 + $0x18] sm:$0xff] }
 0x15d   :  { %1031 = vmatprep.mubr.msk.f32.mxu0 %vm428_vm2, %v65_v43  ;;  %1036 = vmatprep.mubr.msk.f32.mxu1 %vm428_vm2, %v75_v44 }
 0x160   :  { %584 = vmatmul.mubr.f32.gmra.mrb[56].mxu0 %v64_v45  ;;  %609 = vmatmul.mubr.f32.gmra.mrb[6].mxu1 %v74_v46 }
 0x161   :  { %1032 = vmatprep.mubr.msk.f32.mxu0 %vm428_vm2, %v67_v47  ;;  %1037 = vmatprep.mubr.msk.f32.mxu1 %vm428_vm2, %v77_v48 }
 0x164   :  { %589 = vmatmul.mubr.f32.gmra.mrb[58].mxu0 %v66_v49  ;;  %614 = vmatmul.mubr.f32.gmra.mrb[8].mxu1 %v76_v50 }
 0x165   :  { %1038 = vmatprep.mubr.msk.f32.mxu1 %vm428_vm2, %v79_v51  ;;  %v407_v51 = vld [vmem:[#allocation2 + $0x20] sm:$0xff] }
 0x168   :  { %619 = vmatmul.mubr.f32.gmra.mrb[10].mxu1 %v78_v52  ;;  %v412_v52 = vld [vmem:[#allocation2 + $0x48] sm:$0xff] }
 0x169   :  { %1039 = vmatprep.mubr.msk.f32.mxu1 %vm428_vm2, %v81_v53 }
 0x16c   :  { %624 = vmatmul.mubr.f32.gmra.mrb[12].mxu1 %v80_v54 }
 0x16d   :  { %1040 = vmatprep.mubr.msk.f32.mxu1 %vm428_vm2, %v83_v55 }
 0x170   :  { %629 = vmatmul.mubr.f32.gmra.mrb[14].mxu1 %v82_v56 }
 0x171   :  { %1041 = vmatprep.mubr.msk.f32.mxu1 %vm428_vm2, %v85_v57 }
 0x174   :  { %634 = vmatmul.mubr.f32.gmra.mrb[16].mxu1 %v84_v58 }
 0x175   :  { %1042 = vmatprep.mubr.msk.f32.mxu1 %vm428_vm2, %v87_v59 }
 0x178   :  { %639 = vmatmul.mubr.f32.gmra.mrb[18].mxu1 %v86_v60 }
 0x179   :  { %1043 = vmatprep.mubr.msk.f32.mxu1 %vm428_vm2, %v89_v61  ;;  %v413_v61 = vld [vmem:[#allocation2 + $0x50] sm:$0xff] }
 0x17c   :  { %644 = vmatmul.mubr.f32.gmra.mrb[20].mxu1 %v88_v62 }
 0x17d   :  { %1044 = vmatprep.mubr.msk.f32.mxu1 %vm428_vm2, %v91_v63 }
 0x180   :  { %649 = vmatmul.mubr.f32.gmra.mrb[22].mxu1 %v90_v2 }
 0x181   :  { %1045 = vmatprep.mubr.msk.f32.mxu1 %vm428_vm2, %v93_v3 }
 0x184   :  { %654 = vmatmul.mubr.f32.gmra.mrb[24].mxu1 %v92_v4 }
 0x185   :  { %1046 = vmatprep.mubr.msk.f32.mxu1 %vm428_vm2, %v95_v5 }
 0x188   :  { %659 = vmatmul.mubr.f32.gmra.mrb[26].mxu1 %v94_v6 }
 0x189   :  { %1047 = vmatprep.mubr.msk.f32.mxu1 %vm428_vm2, %v97_v7  ;;  %v414_v7 = vld [vmem:[#allocation2 + $0x58] sm:$0xff] }
 0x18c   :  { %664 = vmatmul.mubr.f32.gmra.mrb[28].mxu1 %v96_v8 }
 0x18d   :  { %1048 = vmatprep.mubr.msk.f32.mxu1 %vm428_vm2, %v99_v9 }
 0x190   :  { %669 = vmatmul.mubr.f32.gmra.mrb[30].mxu1 %v98_v10 }
 0x191   :  { %1049 = vmatprep.mubr.msk.f32.mxu1 %vm428_vm2, %v101_v11 }
 0x194   :  { %674 = vmatmul.mubr.f32.gmra.mrb[32].mxu1 %v100_v12 }
 0x195   :  { %1050 = vmatprep.mubr.msk.f32.mxu1 %vm428_vm2, %v103_v13 }
 0x198   :  { %679 = vmatmul.mubr.f32.gmra.mrb[34].mxu1 %v102_v14 }
 0x199   :  { %1051 = vmatprep.mubr.msk.f32.mxu1 %vm428_vm2, %v105_v15 }
 0x19c   :  { %684 = vmatmul.mubr.f32.gmra.mrb[36].mxu1 %v104_v16 }
 0x19d   :  { %1052 = vmatprep.mubr.msk.f32.mxu1 %vm428_vm2, %v107_v17 }
 0x1a0   :  { %689 = vmatmul.mubr.f32.gmra.mrb[38].mxu1 %v106_v18 }
 0x227   :  { %v570_v21 = vpop.f32.mrb[50].mxu0  ;;  %v595_v22 = vpop.f32.mrb[0].mxu1 }
 0x228   :  { %v694_v23 = vadd.f32 %v570_v21, %v403_v19  ;;  %v699_v24 = vadd.f32 %v595_v22, %v408_v20  ;;  %v597_v25 = vpop.f32.mrb[1].mxu1  ;;  %v572_v26 = vpop.f32.mrb[51].mxu0  ;;  %v415_v19 = vld [vmem:[#allocation2 + $0x60] sm:$0xff] }
 0x22a   :  { %720 = vst.msk [vmem:[#allocation2] sm:$0xff] %vm32_vm3, %v694_v23  ;;  %725 = vst.msk [vmem:[#allocation2 + $0x28] sm:$0xff] %vm32_vm3, %v699_v24 }
 0x22b   :  { %v575_v29 = vpop.f32.mrb[52].mxu0  ;;  %v600_v30 = vpop.f32.mrb[2].mxu1 }
 0x22c   :  { %v695_v31 = vadd.f32 %v575_v29, %v404_v27  ;;  %v700_v32 = vadd.f32 %v600_v30, %v409_v28  ;;  %v602_v33 = vpop.f32.mrb[3].mxu1  ;;  %v577_v34 = vpop.f32.mrb[53].mxu0  ;;  %v416_v30 = vld [vmem:[#allocation2 + $0x68] sm:$0xff] }
 0x22e   :  { %721 = vst.msk [vmem:[#allocation2 + $0x8] sm:$0xff] %vm32_vm3, %v695_v31  ;;  %726 = vst.msk [vmem:[#allocation2 + $0x30] sm:$0xff] %vm32_vm3, %v700_v32 }
 0x22f   :  { %v580_v37 = vpop.f32.mrb[54].mxu0  ;;  %v605_v38 = vpop.f32.mrb[4].mxu1 }
 0x230   :  { %v696_v0 = vadd.f32 %v580_v37, %v405_v35  ;;  %v701_v39 = vadd.f32 %v605_v38, %v410_v36  ;;  %v607_v40 = vpop.f32.mrb[5].mxu1  ;;  %v582_v1 = vpop.f32.mrb[55].mxu0 }
 0x231   :  { %v753_v43 = vld [vmem:[#allocation2 + $0x28] sm:$0xff]  ;;  %v748_v44 = vld [vmem:[#allocation2] sm:$0xff]  ;;  %v417_v40 = vld [vmem:[#allocation2 + $0x70] sm:$0xff] }
 0x232   :  { %722 = vst.msk [vmem:[#allocation2 + $0x10] sm:$0xff] %vm32_vm3, %v696_v0  ;;  %727 = vst.msk [vmem:[#allocation2 + $0x38] sm:$0xff] %vm32_vm3, %v701_v39  ;;  %1239 = vtanh.f32 %v753_v43 }
 0x233   :  { %v610_v45 = vpop.f32.mrb[6].mxu1  ;;  %v585_v46 = vpop.f32.mrb[56].mxu0  ;;  %1241 = vtanh.f32 %v748_v44 }
 0x234   :  { %v702_v47 = vadd.f32 %v610_v45, %v411_v41  ;;  %v612_v48 = vpop.f32.mrb[7].mxu1  ;;  %v697_v49 = vadd.f32 %v585_v46, %v406_v42  ;;  %v587_v50 = vpop.f32.mrb[57].mxu0 }
 0x235   :  { %v749_v53 = vld [vmem:[#allocation2 + $0x8] sm:$0xff]  ;;  %v754_v54 = vld [vmem:[#allocation2 + $0x30] sm:$0xff]  ;;  %v418_v50 = vld [vmem:[#allocation2 + $0x78] sm:$0xff] }
 0x236   :  { %728 = vst.msk [vmem:[#allocation2 + $0x40] sm:$0xff] %vm32_vm3, %v702_v47  ;;  %723 = vst.msk [vmem:[#allocation2 + $0x18] sm:$0xff] %vm32_vm3, %v697_v49  ;;  %1243 = vtanh.f32 %v749_v53 }
 0x237   :  { %v590_v55 = vpop.f32.mrb[58].mxu0  ;;  %v615_v56 = vpop.f32.mrb[8].mxu1  ;;  %1245 = vtanh.f32 %v754_v54 }
 0x238   :  { %v698_v57 = vadd.f32 %v590_v55, %v407_v51  ;;  %v703_v58 = vadd.f32 %v615_v56, %v412_v52  ;;  %v617_v59 = vpop.f32.mrb[9].mxu1  ;;  %v592_v60 = vpop.f32.mrb[59].mxu0 }
 0x239   :  { %v750_v62 = vld [vmem:[#allocation2 + $0x10] sm:$0xff]  ;;  %v755_v63 = vld [vmem:[#allocation2 + $0x38] sm:$0xff]  ;;  %v419_v60 = vld [vmem:[#allocation2 + $0x80] sm:$0xff] }
 0x23a   :  { %724 = vst.msk [vmem:[#allocation2 + $0x20] sm:$0xff] %vm32_vm3, %v698_v57  ;;  %729 = vst.msk [vmem:[#allocation2 + $0x48] sm:$0xff] %vm32_vm3, %v703_v58  ;;  %1247 = vtanh.f32 %v750_v62 }
 0x23b   :  { %v620_v2 = vpop.f32.mrb[10].mxu1  ;;  %1249 = vtanh.f32 %v755_v63 }
 0x23c   :  { %v1676_v3 = vpop.eup %1239  ;;  %v704_v4 = vadd.f32 %v620_v2, %v413_v61  ;;  %v622_v5 = vpop.f32.mrb[11].mxu1 }
 0x23d   :  { %v1678_v6 = vpop.eup %1241  ;;  %v803_v8 = vmul.f32 %v1676_v3, %v1676_v3  ;;  %v756_v9 = vld [vmem:[#allocation2 + $0x40] sm:$0xff]  ;;  %v751_v10 = vld [vmem:[#allocation2 + $0x18] sm:$0xff] }
 0x23e   :  { %730 = vst.msk [vmem:[#allocation2 + $0x50] sm:$0xff] %vm32_vm3, %v704_v4  ;;  %v798_v11 = vmul.f32 %v1678_v6, %v1678_v6  ;;  %1251 = vtanh.f32 %v756_v9  ;;  %v420_v9 = vld [vmem:[#allocation2 + $0x88] sm:$0xff] }
 0x23f   :  { %v625_v12 = vpop.f32.mrb[12].mxu1  ;;  %v838_v13 = vsel %vm32_vm3, %v803_v8, 0.0  ;;  %1253 = vtanh.f32 %v751_v10 }
 0x240   :  { %v1686_v14 = vpop.eup %1243  ;;  %v705_v15 = vadd.f32 %v625_v12, %v414_v7  ;;  %v627_v16 = vpop.f32.mrb[13].mxu1  ;;  %839 = vadd.xlane.f32.xlu1 %v838_v13  ;;  %v823_v17 = vsel %vm32_vm3, %v798_v11, 0.0 }
 0x241   :  { %v1689_v18 = vpop.eup %1245  ;;  %824 = vadd.xlane.f32.xlu0 %v823_v17  ;;  %v799_v20 = vmul.f32 %v1686_v14, %v1686_v14  ;;  %v752_v21 = vld [vmem:[#allocation2 + $0x20] sm:$0xff]  ;;  %v757_v22 = vld [vmem:[#allocation2 + $0x48] sm:$0xff] }
 0x242   :  { %731 = vst.msk [vmem:[#allocation2 + $0x58] sm:$0xff] %vm32_vm3, %v705_v15  ;;  %1255 = vtanh.f32 %v752_v21  ;;  %v804_v28 = vmul.f32 %v1689_v18, %v1689_v18 }
 0x243   :  { %v630_v23 = vpop.f32.mrb[14].mxu1  ;;  %v826_v24 = vsel %vm32_vm3, %v799_v20, 0.0  ;;  %1257 = vtanh.f32 %v757_v22 }
 0x244   :  { %v1695_v25 = vpop.eup %1247  ;;  %v706_v26 = vadd.f32 %v630_v23, %v415_v19  ;;  %v632_v27 = vpop.f32.mrb[15].mxu1  ;;  %v841_v0 = vsel %vm32_vm3, %v804_v28, 0.0  ;;  %v421_v19 = vld [vmem:[#allocation2 + $0x90] sm:$0xff]  ;;  %v422_v28 = vld [vmem:[#allocation2 + $0x98] sm:$0xff] }
 0x245   :  { %v1699_v29 = vpop.eup %1249  ;;  %827 = vadd.xlane.f32.xlu0 %v826_v24  ;;  %v800_v31 = vmul.f32 %v1695_v25, %v1695_v25  ;;  %v758_v32 = vld [vmem:[#allocation2 + $0x50] sm:$0xff] }
 0x246   :  { %732 = vst.msk [vmem:[#allocation2 + $0x60] sm:$0xff] %vm32_vm3, %v706_v26  ;;  %1259 = vtanh.f32 %v758_v32  ;;  %v805_v35 = vmul.f32 %v1699_v29, %v1699_v29 }
 0x247   :  { %v635_v33 = vpop.f32.mrb[16].mxu1  ;;  %v829_v34 = vsel %vm32_vm3, %v800_v31, 0.0 }
 0x248   :  { %v1707_v36 = vpop.eup %1251  ;;  %v707_v37 = vadd.f32 %v635_v33, %v416_v30  ;;  %v637_v38 = vpop.f32.mrb[17].mxu1  ;;  %830 = vadd.xlane.f32.xlu1 %v829_v34  ;;  %v844_v44 = vsel %vm32_vm3, %v805_v35, 0.0 }
 0x249   :  { %v1710_v39 = vpop.eup %1253  ;;  %842 = vadd.xlane.f32.xlu0 %v841_v0  ;;  %v806_v41 = vmul.f32 %v1707_v36, %v1707_v36  ;;  %v759_v1 = vld [vmem:[#allocation2 + $0x58] sm:$0xff]  ;;  %v423_v38 = vld [vmem:[#allocation2 + $0xa0] sm:$0xff] }
 0x24a   :  { %733 = vst.msk [vmem:[#allocation2 + $0x68] sm:$0xff] %vm32_vm3, %v707_v37  ;;  %v801_v42 = vmul.f32 %v1710_v39, %v1710_v39  ;;  %1261 = vtanh.f32 %v759_v1 }
 0x24b   :  { %v640_v43 = vpop.f32.mrb[18].mxu1  ;;  %v847_v45 = vsel %vm32_vm3, %v806_v41, 0.0 }
 0x24c   :  { %v1719_v46 = vpop.eup %1255  ;;  %v708_v47 = vadd.f32 %v640_v43, %v417_v40  ;;  %v642_v48 = vpop.f32.mrb[19].mxu1  ;;  %845 = vadd.xlane.f32.xlu1 %v844_v44  ;;  %v832_v51 = vsel %vm32_vm3, %v801_v42, 0.0 }
 0x24d   :  { %v1721_v49 = vpop.eup %1257  ;;  %848 = vadd.xlane.f32.xlu0 %v847_v45  ;;  %v802_v52 = vmul.f32 %v1719_v46, %v1719_v46  ;;  %v760_v53 = vld [vmem:[#allocation2 + $0x60] sm:$0xff]  ;;  %v424_v45 = vld [vmem:[#allocation2 + $0xa8] sm:$0xff] }
 0x24e   :  { %734 = vst.msk [vmem:[#allocation2 + $0x70] sm:$0xff] %vm32_vm3, %v708_v47  ;;  %1263 = vtanh.f32 %v760_v53  ;;  %v807_v56 = vmul.f32 %v1721_v49, %v1721_v49 }
 0x24f   :  { %v645_v54 = vpop.f32.mrb[20].mxu1  ;;  %v835_v55 = vsel %vm32_vm3, %v802_v52, 0.0 }
 0x250   :  { %v1730_v57 = vpop.eup %1259  ;;  %v709_v58 = vadd.f32 %v645_v54, %v418_v50  ;;  %v647_v59 = vpop.f32.mrb[21].mxu1  ;;  %833 = vadd.xlane.f32.xlu1 %v832_v51  ;;  %v850_v2 = vsel %vm32_vm3, %v807_v56, 0.0 }
 0x251   :  { %836 = vadd.xlane.f32.xlu0 %v835_v55  ;;  %v808_v61 = vmul.f32 %v1730_v57, %v1730_v57  ;;  %v761_v62 = vld [vmem:[#allocation2 + $0x68] sm:$0xff]  ;;  %v425_v55 = vld [vmem:[#allocation2 + $0xb0] sm:$0xff] }
 0x252   :  { %735 = vst.msk [vmem:[#allocation2 + $0x78] sm:$0xff] %vm32_vm3, %v709_v58  ;;  %1265 = vtanh.f32 %v761_v62 }
 0x253   :  { %v650_v63 = vpop.f32.mrb[22].mxu1  ;;  %v853_v4 = vsel %vm32_vm3, %v808_v61, 0.0 }
 0x254   :  { %v1737_v5 = vpop.eup %1261  ;;  %v710_v7 = vadd.f32 %v650_v63, %v419_v60  ;;  %v652_v8 = vpop.f32.mrb[23].mxu1  ;;  %851 = vadd.xlane.f32.xlu1 %v850_v2  ;;  %v426_v2 = vld [vmem:[#allocation2 + $0xb8] sm:$0xff] }
 0x255   :  { %854 = vadd.xlane.f32.xlu0 %v853_v4  ;;  %v809_v10 = vmul.f32 %v1737_v5, %v1737_v5  ;;  %v762_v11 = vld [vmem:[#allocation2 + $0x70] sm:$0xff] }
 0x256   :  { %736 = vst.msk [vmem:[#allocation2 + $0x80] sm:$0xff] %vm32_vm3, %v710_v7  ;;  %1267 = vtanh.f32 %v762_v11 }
 0x257   :  { %v655_v12 = vpop.f32.mrb[24].mxu1  ;;  %v856_v13 = vsel %vm32_vm3, %v809_v10, 0.0 }
 0x258   :  { %v1743_v15 = vpop.eup %1263  ;;  %v711_v16 = vadd.f32 %v655_v12, %v420_v9  ;;  %v657_v17 = vpop.f32.mrb[25].mxu1  ;;  %857 = vadd.xlane.f32.xlu1 %v856_v13  ;;  %v427_v13 = vld [vmem:[#allocation2 + $0xc0] sm:$0xff] }
 0x259   :  { %v810_v20 = vmul.f32 %v1743_v15, %v1743_v15  ;;  %v763_v21 = vld [vmem:[#allocation2 + $0x78] sm:$0xff] }
 0x25a   :  { %737 = vst.msk [vmem:[#allocation2 + $0x88] sm:$0xff] %vm32_vm3, %v711_v16  ;;  %1269 = vtanh.f32 %v763_v21 }
 0x25b   :  { %v660_v22 = vpop.f32.mrb[26].mxu1  ;;  %v859_v23 = vsel %vm32_vm3, %v810_v20, 0.0 }
 0x25c   :  { %v1749_v24 = vpop.eup %1265  ;;  %v712_v26 = vadd.f32 %v660_v22, %v421_v19  ;;  %v662_v27 = vpop.f32.mrb[27].mxu1  ;;  %860 = vadd.xlane.f32.xlu0 %v859_v23 }
 0x25d   :  { %v811_v30 = vmul.f32 %v1749_v24, %v1749_v24  ;;  %v764_v31 = vld [vmem:[#allocation2 + $0x80] sm:$0xff] }
 0x25e   :  { %738 = vst.msk [vmem:[#allocation2 + $0x90] sm:$0xff] %vm32_vm3, %v712_v26  ;;  %1271 = vtanh.f32 %v764_v31 }
 0x25f   :  { %v665_v32 = vpop.f32.mrb[28].mxu1  ;;  %v862_v33 = vsel %vm32_vm3, %v811_v30, 0.0 }
 0x260   :  { %v1755_v34 = vpop.eup %1267  ;;  %v713_v35 = vadd.f32 %v665_v32, %v422_v28  ;;  %v667_v37 = vpop.f32.mrb[29].mxu1  ;;  %863 = vadd.xlane.f32.xlu1 %v862_v33 }
 0x261   :  { %v812_v0 = vmul.f32 %v1755_v34, %v1755_v34  ;;  %v765_v40 = vld [vmem:[#allocation2 + $0x88] sm:$0xff] }
 0x262   :  { %739 = vst.msk [vmem:[#allocation2 + $0x98] sm:$0xff] %vm32_vm3, %v713_v35  ;;  %1273 = vtanh.f32 %v765_v40 }
 0x263   :  { %v670_v41 = vpop.f32.mrb[30].mxu1  ;;  %v865_v1 = vsel %vm32_vm3, %v812_v0, 0.0 }
 0x264   :  { %v1761_v42 = vpop.eup %1269  ;;  %v714_v43 = vadd.f32 %v670_v41, %v423_v38  ;;  %v672_v44 = vpop.f32.mrb[31].mxu1  ;;  %866 = vadd.xlane.f32.xlu0 %v865_v1 }
 0x265   :  { %v813_v47 = vmul.f32 %v1761_v42, %v1761_v42  ;;  %v766_v48 = vld [vmem:[#allocation2 + $0x90] sm:$0xff] }
 0x266   :  { %740 = vst.msk [vmem:[#allocation2 + $0xa0] sm:$0xff] %vm32_vm3, %v714_v43  ;;  %1275 = vtanh.f32 %v766_v48 }
 0x267   :  { %v675_v50 = vpop.f32.mrb[32].mxu1  ;;  %v868_v51 = vsel %vm32_vm3, %v813_v47, 0.0 }
 0x268   :  { %v1767_v52 = vpop.eup %1271  ;;  %v715_v53 = vadd.f32 %v675_v50, %v424_v45  ;;  %v677_v54 = vpop.f32.mrb[33].mxu1  ;;  %869 = vadd.xlane.f32.xlu1 %v868_v51 }
 0x269   :  { %v814_v56 = vmul.f32 %v1767_v52, %v1767_v52  ;;  %v767_v58 = vld [vmem:[#allocation2 + $0x98] sm:$0xff] }
 0x26a   :  { %741 = vst.msk [vmem:[#allocation2 + $0xa8] sm:$0xff] %vm32_vm3, %v715_v53  ;;  %1277 = vtanh.f32 %v767_v58 }
 0x26b   :  { %v680_v59 = vpop.f32.mrb[34].mxu1  ;;  %v871_v60 = vsel %vm32_vm3, %v814_v56, 0.0 }
 0x26c   :  { %v1773_v61 = vpop.eup %1273  ;;  %v716_v62 = vadd.f32 %v680_v59, %v425_v55  ;;  %v682_v63 = vpop.f32.mrb[35].mxu1  ;;  %872 = vadd.xlane.f32.xlu0 %v871_v60 }
 0x26d   :  { %v815_v4 = vmul.f32 %v1773_v61, %v1773_v61  ;;  %v768_v7 = vld [vmem:[#allocation2 + $0xa0] sm:$0xff] }
 0x26e   :  { %742 = vst.msk [vmem:[#allocation2 + $0xb0] sm:$0xff] %vm32_vm3, %v716_v62  ;;  %1279 = vtanh.f32 %v768_v7 }
 0x26f   :  { %v685_v8 = vpop.f32.mrb[36].mxu1  ;;  %v874_v9 = vsel %vm32_vm3, %v815_v4, 0.0 }
 0x270   :  { %v1779_v10 = vpop.eup %1275  ;;  %v717_v11 = vadd.f32 %v685_v8, %v426_v2  ;;  %v687_v12 = vpop.f32.mrb[37].mxu1  ;;  %875 = vadd.xlane.f32.xlu1 %v874_v9 }
 0x271   :  { %v816_v16 = vmul.f32 %v1779_v10, %v1779_v10  ;;  %v769_v17 = vld [vmem:[#allocation2 + $0xa8] sm:$0xff] }
 0x272   :  { %743 = vst.msk [vmem:[#allocation2 + $0xb8] sm:$0xff] %vm32_vm3, %v717_v11  ;;  %1281 = vtanh.f32 %v769_v17 }
 0x273   :  { %v690_v19 = vpop.f32.mrb[38].mxu1  ;;  %v877_v20 = vsel %vm32_vm3, %v816_v16, 0.0 }
 0x274   :  { %v1785_v21 = vpop.eup %1277  ;;  %v718_v22 = vadd.f32 %v690_v19, %v427_v13  ;;  %v692_v23 = vpop.f32.mrb[39].mxu1  ;;  %878 = vadd.xlane.f32.xlu0 %v877_v20 }
 0x275   :  { %v817_v26 = vmul.f32 %v1785_v21, %v1785_v21  ;;  %v770_v27 = vld [vmem:[#allocation2 + $0xb0] sm:$0xff] }
 0x276   :  { %744 = vst.msk [vmem:[#allocation2 + $0xc0] sm:$0xff] %vm32_vm3, %v718_v22  ;;  %1283 = vtanh.f32 %v770_v27 }
 0x277   :  { %v880_v28 = vsel %vm32_vm3, %v817_v26, 0.0 }
 0x278   :  { %v1791_v30 = vpop.eup %1279  ;;  %881 = vadd.xlane.f32.xlu1 %v880_v28 }
 0x279   :  { %v818_v31 = vmul.f32 %v1791_v30, %v1791_v30  ;;  %v771_v32 = vld [vmem:[#allocation2 + $0xb8] sm:$0xff] }
 0x27a   :  { %1285 = vtanh.f32 %v771_v32 }
 0x27b   :  { %v883_v33 = vsel %vm32_vm3, %v818_v31, 0.0 }
 0x27c   :  { %v1796_v35 = vpop.eup %1281  ;;  %884 = vadd.xlane.f32.xlu0 %v883_v33 }
 0x27d   :  { %v819_v37 = vmul.f32 %v1796_v35, %v1796_v35  ;;  %v772_v38 = vld [vmem:[#allocation2 + $0xc0] sm:$0xff] }
 0x27e   :  { %1287 = vtanh.f32 %v772_v38 }
 0x27f   :  { %v886_v0 = vsel %vm32_vm3, %v819_v37, 0.0 }
 0x280   :  { %v1801_v40 = vpop.eup %1283  ;;  %887 = vadd.xlane.f32.xlu1 %v886_v0 }
 0x281   :  { %v820_v41 = vmul.f32 %v1801_v40, %v1801_v40 }
 0x283   :  { %v889_v1 = vsel %vm32_vm3, %v820_v41, 0.0 }
 0x284   :  { %v1806_v43 = vpop.eup %1285  ;;  %890 = vadd.xlane.f32.xlu0 %v889_v1 }
 0x285   :  { %v821_v44 = vmul.f32 %v1806_v43, %v1806_v43 }
 0x287   :  { %v892_v45 = vsel %vm32_vm3, %v821_v44, 0.0 }
 0x288   :  { %v1811_v47 = vpop.eup %1287  ;;  %893 = vadd.xlane.f32.xlu1 %v892_v45 }
 0x289   :  { %v822_v48 = vmul.f32 %v1811_v47, %v1811_v47 }
 0x28b   :  { %v895_v50 = vsel %vm32_vm3, %v822_v48, 0.0 }
 0x28c   :  { %896 = vadd.xlane.f32.xlu0 %v895_v50 }
 0x2cd   :  { %v840_v51 = vpop.xlane.xlu1 %839 }
 0x2ce   :  { %v903_v53 = vmax.f32 %v840_v51, 1e-24  ;;  %v825_v54 = vpop.xlane.xlu0 %824 }
 0x2cf   :  { %v898_v55 = vmax.f32 %v825_v54, 1e-24 }
 0x2d0   :  { %1289 = vrsqrt.f32 %v903_v53 }
 0x2d1   :  { %1291 = vrsqrt.f32 %v898_v55 }
 0x2d2   :  { %v828_v56 = vpop.xlane.xlu0 %827 }
 0x2d3   :  { %v899_v58 = vmax.f32 %v828_v56, 1e-24 }
 0x2d5   :  { %1293 = vrsqrt.f32 %v899_v58  ;;  %v831_v59 = vpop.xlane.xlu1 %830 }
 0x2d6   :  { %v900_v60 = vmax.f32 %v831_v59, 1e-24  ;;  %v843_v62 = vpop.xlane.xlu0 %842 }
 0x2d7   :  { %v904_v63 = vmax.f32 %v843_v62, 1e-24 }
 0x2d8   :  { %1295 = vrsqrt.f32 %v900_v60 }
 0x2d9   :  { %1297 = vrsqrt.f32 %v904_v63  ;;  %v846_v2 = vpop.xlane.xlu1 %845 }
 0x2da   :  { %v1290_v4 = vpop.eup %1289  ;;  %v905_v7 = vmax.f32 %v846_v2, 1e-24  ;;  %v849_v8 = vpop.xlane.xlu0 %848 }
 0x2db   :  { %v1292_v9 = vpop.eup %1291  ;;  %v953_v11 = vmul.f32 %v1290_v4, %v1676_v3  ;;  %v906_v12 = vmax.f32 %v849_v8, 1e-24 }
 0x2dc   :  { %v948_v13 = vmul.f32 %v1292_v9, %v1678_v6  ;;  %1299 = vrsqrt.f32 %v905_v7 }
 0x2dd   :  { %978 = vst.msk [vmem:[%s1944_s3 + $0x28] sm:$0xff] %vm32_vm3, %v953_v11  ;;  %1301 = vrsqrt.f32 %v906_v12  ;;  %v834_v16 = vpop.xlane.xlu1 %833 }
 0x2de   :  { %973 = vst.msk [vmem:[%s1944_s3] sm:$0xff] %vm32_vm3, %v948_v13  ;;  %v901_v17 = vmax.f32 %v834_v16, 1e-24  ;;  %v837_v19 = vpop.xlane.xlu0 %836 }
 0x2df   :  { %v1294_v20 = vpop.eup %1293  ;;  %v902_v3 = vmax.f32 %v837_v19, 1e-24 }
 0x2e0   :  { %v949_v22 = vmul.f32 %v1294_v20, %v1686_v14  ;;  %1303 = vrsqrt.f32 %v901_v17 }
 0x2e1   :  { %1305 = vrsqrt.f32 %v902_v3  ;;  %v852_v6 = vpop.xlane.xlu1 %851 }
 0x2e2   :  { %v1296_v23 = vpop.eup %1295  ;;  %974 = vst.msk [vmem:[%s1944_s3 + $0x8] sm:$0xff] %vm32_vm3, %v949_v22  ;;  %v907_v26 = vmax.f32 %v852_v6, 1e-24  ;;  %v855_v27 = vpop.xlane.xlu0 %854 }
 0x2e3   :  { %v1298_v28 = vpop.eup %1297  ;;  %v950_v31 = vmul.f32 %v1296_v23, %v1695_v25  ;;  %v908_v32 = vmax.f32 %v855_v27, 1e-24 }
 0x2e4   :  { %v954_v33 = vmul.f32 %v1298_v28, %v1689_v18  ;;  %1307 = vrsqrt.f32 %v907_v26 }
 0x2e5   :  { %975 = vst.msk [vmem:[%s1944_s3 + $0x10] sm:$0xff] %vm32_vm3, %v950_v31  ;;  %1309 = vrsqrt.f32 %v908_v32  ;;  %v858_v14 = vpop.xlane.xlu1 %857 }
 0x2e6   :  { %v1300_v37 = vpop.eup %1299  ;;  %979 = vst.msk [vmem:[%s1944_s3 + $0x30] sm:$0xff] %vm32_vm3, %v954_v33  ;;  %v909_v38 = vmax.f32 %v858_v14, 1e-24 }
 0x2e7   :  { %v1302_v0 = vpop.eup %1301  ;;  %v955_v25 = vmul.f32 %v1300_v37, %v1699_v29 }
 0x2e8   :  { %v956_v18 = vmul.f32 %v1302_v0, %v1707_v36  ;;  %1311 = vrsqrt.f32 %v909_v38 }
 0x2e9   :  { %980 = vst.msk [vmem:[%s1944_s3 + $0x38] sm:$0xff] %vm32_vm3, %v955_v25  ;;  %v861_v41 = vpop.xlane.xlu0 %860 }
 0x2ea   :  { %v1304_v1 = vpop.eup %1303  ;;  %981 = vst.msk [vmem:[%s1944_s3 + $0x40] sm:$0xff] %vm32_vm3, %v956_v18  ;;  %v910_v44 = vmax.f32 %v861_v41, 1e-24 }
 0x2eb   :  { %v1306_v45 = vpop.eup %1305  ;;  %v951_v48 = vmul.f32 %v1304_v1, %v1710_v39 }
 0x2ec   :  { %v952_v29 = vmul.f32 %v1306_v45, %v1719_v46  ;;  %1313 = vrsqrt.f32 %v910_v44 }
 0x2ed   :  { %976 = vst.msk [vmem:[%s1944_s3 + $0x18] sm:$0xff] %vm32_vm3, %v951_v48  ;;  %v864_v36 = vpop.xlane.xlu1 %863 }
 0x2ee   :  { %v1308_v50 = vpop.eup %1307  ;;  %977 = vst.msk [vmem:[%s1944_s3 + $0x20] sm:$0xff] %vm32_vm3, %v952_v29  ;;  %v911_v51 = vmax.f32 %v864_v36, 1e-24 }
 0x2ef   :  { %v1310_v53 = vpop.eup %1309  ;;  %v957_v54 = vmul.f32 %v1308_v50, %v1721_v49 }
 0x2f0   :  { %v958_v39 = vmul.f32 %v1310_v53, %v1730_v57  ;;  %1315 = vrsqrt.f32 %v911_v51 }
 0x2f1   :  { %982 = vst.msk [vmem:[%s1944_s3 + $0x48] sm:$0xff] %vm32_vm3, %v957_v54  ;;  %v867_v46 = vpop.xlane.xlu0 %866 }
 0x2f2   :  { %v1312_v55 = vpop.eup %1311  ;;  %983 = vst.msk [vmem:[%s1944_s3 + $0x50] sm:$0xff] %vm32_vm3, %v958_v39  ;;  %v912_v56 = vmax.f32 %v867_v46, 1e-24 }
 0x2f3   :  { %v959_v58 = vmul.f32 %v1312_v55, %v1737_v5 }
 0x2f4   :  { %1317 = vrsqrt.f32 %v912_v56 }
 0x2f5   :  { %984 = vst.msk [vmem:[%s1944_s3 + $0x58] sm:$0xff] %vm32_vm3, %v959_v58  ;;  %v870_v49 = vpop.xlane.xlu1 %869 }
 0x2f6   :  { %v1314_v57 = vpop.eup %1313  ;;  %v913_v59 = vmax.f32 %v870_v49, 1e-24 }
 0x2f7   :  { %v960_v60 = vmul.f32 %v1314_v57, %v1743_v15 }
 0x2f8   :  { %1319 = vrsqrt.f32 %v913_v59 }
 0x2f9   :  { %985 = vst.msk [vmem:[%s1944_s3 + $0x60] sm:$0xff] %vm32_vm3, %v960_v60  ;;  %v873_v62 = vpop.xlane.xlu0 %872 }
 0x2fa   :  { %v1316_v63 = vpop.eup %1315  ;;  %v914_v5 = vmax.f32 %v873_v62, 1e-24 }
 0x2fb   :  { %v961_v2 = vmul.f32 %v1316_v63, %v1749_v24 }
 0x2fc   :  { %1321 = vrsqrt.f32 %v914_v5 }
 0x2fd   :  { %986 = vst.msk [vmem:[%s1944_s3 + $0x68] sm:$0xff] %vm32_vm3, %v961_v2  ;;  %v876_v4 = vpop.xlane.xlu1 %875 }
 0x2fe   :  { %v1318_v7 = vpop.eup %1317  ;;  %v915_v15 = vmax.f32 %v876_v4, 1e-24 }
 0x2ff   :  { %v962_v8 = vmul.f32 %v1318_v7, %v1755_v34 }
 0x300   :  { %1323 = vrsqrt.f32 %v915_v15 }
 0x301   :  { %987 = vst.msk [vmem:[%s1944_s3 + $0x70] sm:$0xff] %vm32_vm3, %v962_v8  ;;  %v879_v9 = vpop.xlane.xlu0 %878 }
 0x302   :  { %v1320_v11 = vpop.eup %1319  ;;  %v916_v24 = vmax.f32 %v879_v9, 1e-24 }
 0x303   :  { %v963_v12 = vmul.f32 %v1320_v11, %v1761_v42 }
 0x304   :  { %1325 = vrsqrt.f32 %v916_v24 }
 0x305   :  { %988 = vst.msk [vmem:[%s1944_s3 + $0x78] sm:$0xff] %vm32_vm3, %v963_v12  ;;  %v882_v13 = vpop.xlane.xlu1 %881 }
 0x306   :  { %v1322_v16 = vpop.eup %1321  ;;  %v917_v34 = vmax.f32 %v882_v13, 1e-24 }
 0x307   :  { %v964_v17 = vmul.f32 %v1322_v16, %v1767_v52 }
 0x308   :  { %1327 = vrsqrt.f32 %v917_v34 }
 0x309   :  { %989 = vst.msk [vmem:[%s1944_s3 + $0x80] sm:$0xff] %vm32_vm3, %v964_v17  ;;  %v885_v19 = vpop.xlane.xlu0 %884 }
 0x30a   :  { %v1324_v20 = vpop.eup %1323  ;;  %v918_v42 = vmax.f32 %v885_v19, 1e-24 }
 0x30b   :  { %v965_v3 = vmul.f32 %v1324_v20, %v1773_v61 }
 0x30c   :  { %1329 = vrsqrt.f32 %v918_v42 }
 0x30d   :  { %990 = vst.msk [vmem:[%s1944_s3 + $0x88] sm:$0xff] %vm32_vm3, %v965_v3  ;;  %v888_v22 = vpop.xlane.xlu1 %887 }
 0x30e   :  { %v1326_v6 = vpop.eup %1325  ;;  %v919_v52 = vmax.f32 %v888_v22, 1e-24 }
 0x30f   :  { %v966_v23 = vmul.f32 %v1326_v6, %v1779_v10 }
 0x310   :  { %1331 = vrsqrt.f32 %v919_v52 }
 0x311   :  { %991 = vst.msk [vmem:[%s1944_s3 + $0x90] sm:$0xff] %vm32_vm3, %v966_v23  ;;  %v891_v26 = vpop.xlane.xlu0 %890 }
 0x312   :  { %v1328_v27 = vpop.eup %1327  ;;  %v920_v61 = vmax.f32 %v891_v26, 1e-24 }
 0x313   :  { %v967_v28 = vmul.f32 %v1328_v27, %v1785_v21 }
 0x314   :  { %1333 = vrsqrt.f32 %v920_v61 }
 0x315   :  { %992 = vst.msk [vmem:[%s1944_s3 + $0x98] sm:$0xff] %vm32_vm3, %v967_v28  ;;  %v894_v31 = vpop.xlane.xlu1 %893 }
 0x316   :  { %v1330_v32 = vpop.eup %1329  ;;  %v921_v10 = vmax.f32 %v894_v31, 1e-24 }
 0x317   :  { %v968_v33 = vmul.f32 %v1330_v32, %v1791_v30 }
 0x318   :  { %1335 = vrsqrt.f32 %v921_v10 }
 0x319   :  { %993 = vst.msk [vmem:[%s1944_s3 + $0xa0] sm:$0xff] %vm32_vm3, %v968_v33  ;;  %v897_v14 = vpop.xlane.xlu0 %896 }
 0x31a   :  { %v1332_v37 = vpop.eup %1331  ;;  %v922_v21 = vmax.f32 %v897_v14, 1e-24 }
 0x31b   :  { %v969_v38 = vmul.f32 %v1332_v37, %v1796_v35 }
 0x31c   :  { %1337 = vrsqrt.f32 %v922_v21 }
 0x31d   :  { %994 = vst.msk [vmem:[%s1944_s3 + $0xa8] sm:$0xff] %vm32_vm3, %v969_v38 }
 0x31e   :  { %v1334_v0 = vpop.eup %1333 }
 0x31f   :  { %v970_v30 = vmul.f32 %v1334_v0, %v1801_v40 }
 0x321   :  { %995 = vst.msk [vmem:[%s1944_s3 + $0xb0] sm:$0xff] %vm32_vm3, %v970_v30 }
 0x322   :  { %v1336_v25 = vpop.eup %1335 }
 0x323   :  { %v971_v18 = vmul.f32 %v1336_v25, %v1806_v43 }
 0x325   :  { %996 = vst.msk [vmem:[%s1944_s3 + $0xb8] sm:$0xff] %vm32_vm3, %v971_v18 }
 0x326   :  { %v1338_v35 = vpop.eup %1337 }
 0x327   :  { %v972_v41 = vmul.f32 %v1338_v35, %v1811_v47 }
 0x329   :  { %997 = vst.msk [vmem:[%s1944_s3 + $0xc0] sm:$0xff] %vm32_vm3, %v972_v41 }
 0x32a   :  { %1002 = vsyncpa [#allocation4], 1 }

</bundles_post_ra>
